<compile_context>
chip_gen: v5e
topology: v5e:2x2
jax: 0.10.0
libtpu: 0.0.40
codegen_flags: <defaults>
</compile_context>

<pallas_src>
import functools

import jax
import jax.numpy as jnp
from jax.experimental import pallas as pl
from jax.experimental.pallas import tpu as pltpu


def _round_up(x, m):
    return (x + m - 1) // m * m


def _ffn_kernel(x_ref, w1_ref, b1_ref, w2_ref, b2_ref, o_ref, acc_ref):
    # x_ref:  (tile_n, D)   bf16 row tile of tokens
    # w1_ref: (D, tile_h)   bf16 hidden-block of first Linear
    # b1_ref: (1, tile_h)   f32
    # w2_ref: (tile_h, D)   bf16 hidden-block of second Linear
    # b2_ref: (1, D)        f32
    # acc_ref:(tile_n, D)   f32 partial-output accumulator over hidden blocks
    k = pl.program_id(1)

    @pl.when(k == 0)
    def _():
        acc_ref[...] = jnp.zeros_like(acc_ref)

    # First Linear for this hidden block: bf16 on the MXU, f32 accumulation.
    h = jnp.dot(x_ref[...], w1_ref[...], preferred_element_type=jnp.float32)
    h = h + b1_ref[...]

    # Exact (erf) GELU in f32, matching torch.nn.GELU() default (approximate='none').
    h = 0.5 * h * (1.0 + jax.lax.erf(h * jnp.float32(0.7071067811865476)))

    # Second Linear: partial contraction over this hidden block, f32 accumulation.
    acc_ref[...] += jnp.dot(h.astype(w2_ref.dtype), w2_ref[...],
                            preferred_element_type=jnp.float32)

    @pl.when(k == pl.num_programs(1) - 1)
    def _():
        # Bias added exactly once in the finalize step. Dropout = identity (eval).
        o_ref[...] = (acc_ref[...] + b2_ref[...]).astype(o_ref.dtype)


def _device_budget():
    """Per-generation (tile_n, tile_h, vmem_limit_bytes, two_tensorcore_hint)."""
    vmem = None
    try:
        info = pltpu.get_tpu_info()
        vmem = getattr(info, "vmem_capacity_bytes", None)
    except Exception:
        vmem = None
    if vmem is None:
        vmem = 64 * 1024 * 1024  # conservative (assume smallest VMEM)
    if vmem >= 100 * 1024 * 1024:
        # v5e / v6e: 128 MiB VMEM, single TensorCore. Large tiles -> compute-bound
        # against weight streaming, fewer k-steps -> less accumulator RMW traffic.
        return 768, 1024, 100 * 1024 * 1024, False
    # v7x (or unknown): 64 MiB VMEM, 2 TensorCores per chip.
    return 512, 512, 56 * 1024 * 1024, True


@functools.partial(jax.jit, static_argnames=("tile_n", "tile_h", "compute_dtype"))
def feed_forward(x, w1, b1, w2, b2, *, tile_n=None, tile_h=None,
                 compute_dtype=jnp.bfloat16):
    """x: [B, T, D]; w1: [D, 4D]; b1: [4D]; w2: [4D, D]; b2: [D] -> [B, T, D]."""
    B, T, D = x.shape
    H = w1.shape[1]
    N = B * T
    out_dtype = x.dtype

    def_tn, def_th, vmem_limit, two_tc = _device_budget()
    tile_n = def_tn if tile_n is None else tile_n
    tile_h = def_th if tile_h is None else tile_h

    # bf16 compute path: MXU-native, halves HBM/VMEM bytes. f32 accumulation kept.
    xc = x.reshape(N, D).astype(compute_dtype)
    w1c = w1.astype(compute_dtype)
    w2c = w2.astype(compute_dtype)

    # Hidden-axis tile: a lane-aligned divisor of the (padded) hidden dim, so for
    # typical H = 4*D no weight padding is materialized inside the jitted wrapper.
    Hp = _round_up(H, 128)
    th = min(_round_up(tile_h, 128), Hp)
    while Hp % th != 0:
        th -= 128

    # Token-axis tile (sublane-aligned).
    tn = min(_round_up(tile_n, 8), _round_up(N, 8))
    if two_tc and N > 8 and _round_up(N, tn) // tn < 2:
        # v7x: 2 TensorCores per chip — make sure the "parallel" axis has >= 2
        # tiles so the chip isn't half idle for small-batch shapes.
        tn = max(8, _round_up((N + 1) // 2, 8))
    Np = _round_up(N, tn)

    if Np != N:
        xc = jnp.pad(xc, ((0, Np - N), (0, 0)))
    if Hp != H:
        # Only for lane-unaligned H (H = 4*D is normally a multiple of 256).
        # Padded hidden columns contribute 0: b1/w2 pads are 0 and GELU(0)=0.
        w1c = jnp.pad(w1c, ((0, 0), (0, Hp - H)))
        b1 = jnp.pad(b1, (0, Hp - H))
        w2c = jnp.pad(w2c, ((0, Hp - H), (0, 0)))
    b1_2 = b1.reshape(1, Hp).astype(jnp.float32)
    b2_2 = b2.reshape(1, D).astype(jnp.float32)

    n_row_tiles = Np // tn
    isz = lambda a: a.size * a.dtype.itemsize
    cost = pl.CostEstimate(
        flops=4 * Np * D * Hp,                         # two matmuls: 2*N*D*H each
        transcendentals=Np * Hp,                       # erf per hidden activation
        bytes_accessed=(isz(xc)
                        + n_row_tiles * (isz(w1c) + isz(w2c))   # weights re-streamed per row tile
                        + isz(b1_2) + isz(b2_2)
                        + Np * D * jnp.dtype(out_dtype).itemsize),
    )

    out = pl.pallas_call(
        _ffn_kernel,
        out_shape=jax.ShapeDtypeStruct((Np, D), out_dtype),
        grid_spec=pltpu.PrefetchScalarGridSpec(
            num_scalar_prefetch=0,
            grid=(n_row_tiles, Hp // th),
            in_specs=[
                pl.BlockSpec((tn, D), lambda i, k: (i, 0)),   # x row tile
                pl.BlockSpec((D, th), lambda i, k: (0, k)),   # w1 hidden block
                pl.BlockSpec((1, th), lambda i, k: (0, k)),   # b1 hidden block
                pl.BlockSpec((th, D), lambda i, k: (k, 0)),   # w2 hidden block
                pl.BlockSpec((1, D), lambda i, k: (0, 0)),    # b2 (full, tiny)
            ],
            out_specs=pl.BlockSpec((tn, D), lambda i, k: (i, 0)),
            scratch_shapes=[pltpu.VMEM((tn, D), jnp.float32)],
        ),
        compiler_params=pltpu.CompilerParams(
            # Token-tile axis shards across TensorCores; hidden reduction is
            # innermost and "arbitrary" (accumulator revisits the output block).
            dimension_semantics=("parallel", "arbitrary"),
            vmem_limit_bytes=vmem_limit,
        ),
        cost_estimate=cost,
    )(xc, w1c, b1_2, w2c, b2_2)

    return out[:N].reshape(B, T, D)


def _init_params(key, embd_dim):
    """Deterministic init mimicking nn.Linear (uniform(-1/sqrt(fan_in), 1/sqrt(fan_in)))."""
    hidden = 4 * embd_dim
    k1, k2, k3, k4 = jax.random.split(key, 4)
    bound1 = 1.0 / jnp.sqrt(embd_dim)
    bound2 = 1.0 / jnp.sqrt(hidden)
    # Stored as (in_dim, out_dim) so the kernel does x @ W (== x @ weight.T in torch).
    w1 = jax.random.uniform(k1, (embd_dim, hidden), jnp.float32, -bound1, bound1)
    b1 = jax.random.uniform(k2, (hidden,), jnp.float32, -bound1, bound1)
    w2 = jax.random.uniform(k3, (hidden, embd_dim), jnp.float32, -bound2, bound2)
    b2 = jax.random.uniform(k4, (embd_dim,), jnp.float32, -bound2, bound2)
    return w1, b1, w2, b2


if __name__ == "__main__":
    key = jax.random.PRNGKey(0)
    kx, kp = jax.random.split(key)

    B, T, D = 2, 8, 32          # batch=2, seq=8, embd_dim=32 -> hidden=128
    dropout = 0.1               # eval mode: dropout is identity

    x = jax.random.normal(kx, (B, T, D), dtype=jnp.float32)
    w1, b1, w2, b2 = _init_params(kp, D)

    y = feed_forward(x, w1, b1, w2, b2)
    jax.block_until_ready(y)

    # Pure-JAX f32 reference (exact erf GELU, no dropout at inference). Tolerance
    # is loosened to account for the bf16 compute path inside the kernel.
    ref_h = x.reshape(-1, D) @ w1 + b1
    ref_h = jax.nn.gelu(ref_h, approximate=False)
    ref = (ref_h @ w2 + b2).reshape(B, T, D)
    assert jnp.allclose(y, ref, atol=3e-2, rtol=3e-2), "mismatch vs reference"

    print("KERNEL_OK")
</pallas_src>

<mosaic_0001>
module attributes {stable_mosaic.version = 11 : i64} {
  func.func @_ffn_kernel(%arg0: i32, %arg1: i32, %arg2: memref<8x32xbf16, #tpu.memory_space<vmem>>, %arg3: memref<32x128xbf16, #tpu.memory_space<vmem>>, %arg4: memref<1x128xf32, #tpu.memory_space<vmem>>, %arg5: memref<128x32xbf16, #tpu.memory_space<vmem>>, %arg6: memref<1x32xf32, #tpu.memory_space<vmem>>, %arg7: memref<8x32xf32, #tpu.memory_space<vmem>>, %arg8: memref<8x32xf32, #tpu.memory_space<vmem>>) attributes {dimension_semantics = [#tpu.dimension_semantics<parallel>, #tpu.dimension_semantics<arbitrary>], iteration_bounds = array<i64: 2, 1>, scalar_prefetch = 0 : i64, scratch_operands = 1 : i64, tpu.core_type = #tpu.core_type<tc>, window_params = [{transform_indices = @transform_0, window_bounds = array<i64: 8, 32>}, {transform_indices = @transform_1, window_bounds = array<i64: 32, 128>}, {transform_indices = @transform_2, window_bounds = array<i64: 1, 128>}, {transform_indices = @transform_3, window_bounds = array<i64: 128, 32>}, {pipeline_mode = #tpu.pipeline_mode<synchronous>, transform_indices = @transform_4, window_bounds = array<i64: 1, 32>}, {transform_indices = @transform_5, window_bounds = array<i64: 8, 32>}]} {
    %c0_i32 = arith.constant 0 : i32
    %0 = arith.cmpi eq, %arg1, %c0_i32 : i32
    %1 = arith.extui %0 : i1 to i32
    %c0_i32_0 = arith.constant 0 : i32
    %2 = arith.cmpi ne, %1, %c0_i32_0 : i32
    scf.if %2 {
      %cst_18 = arith.constant 0.000000e+00 : f32
      %26 = vector.broadcast %cst_18 : f32 to vector<8x32xf32>
      %c0_19 = arith.constant 0 : index
      %c0_20 = arith.constant 0 : index
      %27 = vector.load %arg8[%c0_19, %c0_20] : memref<8x32xf32, #tpu.memory_space<vmem>>, vector<8x32xf32>
      tpu.vector_store %arg8[%c0_19, %c0_20], %26 {strides = array<i32>} : memref<8x32xf32, #tpu.memory_space<vmem>>, vector<8x32xf32>,
    } else {
    }
    %c0 = arith.constant 0 : index
    %c0_1 = arith.constant 0 : index
    %3 = vector.load %arg2[%c0, %c0_1] : memref<8x32xbf16, #tpu.memory_space<vmem>>, vector<8x32xbf16>
    %c0_2 = arith.constant 0 : index
    %c0_3 = arith.constant 0 : index
    %4 = vector.load %arg3[%c0_2, %c0_3] : memref<32x128xbf16, #tpu.memory_space<vmem>>, vector<32x128xbf16>
    %cst = arith.constant dense<0.000000e+00> : vector<8x128xf32>
    %5 = tpu.matmul %3, %4, %cst {dimension_numbers = #tpu.dot_dimension_numbers<[1], [0], [0], [1], [0, 0, 1, 1], [], []>} : vector<8x32xbf16>, vector<32x128xbf16>, vector<8x128xf32> -> vector<8x128xf32>
    %c0_4 = arith.constant 0 : index
    %c0_5 = arith.constant 0 : index
    %6 = vector.load %arg4[%c0_4, %c0_5] : memref<1x128xf32, #tpu.memory_space<vmem>>, vector<1x128xf32>
    %7 = vector.broadcast %6 : vector<1x128xf32> to vector<8x128xf32>
    %8 = arith.addf %5, %7 : vector<8x128xf32>
    %cst_6 = arith.constant 5.000000e-01 : f32
    %9 = vector.broadcast %cst_6 : f32 to vector<8x128xf32>
    %10 = arith.mulf %9, %8 : vector<8x128xf32>
    %cst_7 = arith.constant 0.707106769 : f32
    %11 = vector.broadcast %cst_7 : f32 to vector<8x128xf32>
    %12 = arith.mulf %8, %11 : vector<8x128xf32>
    %13 = math.erf %12 : vector<8x128xf32>
    %cst_8 = arith.constant 1.000000e+00 : f32
    %14 = vector.broadcast %cst_8 : f32 to vector<8x128xf32>
    %15 = arith.addf %14, %13 : vector<8x128xf32>
    %16 = arith.mulf %10, %15 : vector<8x128xf32>
    %c0_9 = arith.constant 0 : index
    %c0_10 = arith.constant 0 : index
    %17 = vector.load %arg8[%c0_9, %c0_10] : memref<8x32xf32, #tpu.memory_space<vmem>>, vector<8x32xf32>
    %18 = arith.truncf %16 : vector<8x128xf32> to vector<8x128xbf16>
    %c0_11 = arith.constant 0 : index
    %c0_12 = arith.constant 0 : index
    %19 = vector.load %arg5[%c0_11, %c0_12] : memref<128x32xbf16, #tpu.memory_space<vmem>>, vector<128x32xbf16>
    %cst_13 = arith.constant dense<0.000000e+00> : vector<8x32xf32>
    %20 = tpu.matmul %18, %19, %cst_13 {dimension_numbers = #tpu.dot_dimension_numbers<[1], [0], [0], [1], [0, 0, 1, 1], [], []>} : vector<8x128xbf16>, vector<128x32xbf16>, vector<8x32xf32> -> vector<8x32xf32>
    %21 = arith.addf %17, %20 : vector<8x32xf32>
    %c0_14 = arith.constant 0 : index
    %c0_15 = arith.constant 0 : index
    %22 = vector.load %arg8[%c0_14, %c0_15] : memref<8x32xf32, #tpu.memory_space<vmem>>, vector<8x32xf32>
    tpu.vector_store %arg8[%c0_14, %c0_15], %21 {strides = array<i32>} : memref<8x32xf32, #tpu.memory_space<vmem>>, vector<8x32xf32>,
    %c0_i32_16 = arith.constant 0 : i32
    %23 = arith.cmpi eq, %arg1, %c0_i32_16 : i32
    %24 = arith.extui %23 : i1 to i32
    %c0_i32_17 = arith.constant 0 : i32
    %25 = arith.cmpi ne, %24, %c0_i32_17 : i32
    scf.if %25 {
      %c0_18 = arith.constant 0 : index
      %c0_19 = arith.constant 0 : index
      %26 = vector.load %arg8[%c0_18, %c0_19] : memref<8x32xf32, #tpu.memory_space<vmem>>, vector<8x32xf32>
      %c0_20 = arith.constant 0 : index
      %c0_21 = arith.constant 0 : index
      %27 = vector.load %arg6[%c0_20, %c0_21] : memref<1x32xf32, #tpu.memory_space<vmem>>, vector<1x32xf32>
      %28 = vector.broadcast %27 : vector<1x32xf32> to vector<8x32xf32>
      %29 = arith.addf %26, %28 : vector<8x32xf32>
      %c0_22 = arith.constant 0 : index
      %c0_23 = arith.constant 0 : index
      %30 = vector.load %arg7[%c0_22, %c0_23] : memref<8x32xf32, #tpu.memory_space<vmem>>, vector<8x32xf32>
      tpu.vector_store %arg7[%c0_22, %c0_23], %29 {strides = array<i32>} : memref<8x32xf32, #tpu.memory_space<vmem>>, vector<8x32xf32>,
    } else {
    }
    return
  }
  func.func @transform_0(%arg0: i32, %arg1: i32) -> (i32, i32) {
    %c0_i32 = arith.constant 0 : i32
    %c0_i32_0 = arith.constant 0 : i32
    return %arg0, %c0_i32 : i32, i32
  }
  func.func @transform_1(%arg0: i32, %arg1: i32) -> (i32, i32) {
    %c0_i32 = arith.constant 0 : i32
    %c0_i32_0 = arith.constant 0 : i32
    return %c0_i32, %arg1 : i32, i32
  }
  func.func @transform_2(%arg0: i32, %arg1: i32) -> (i32, i32) {
    %c0_i32 = arith.constant 0 : i32
    %c0_i32_0 = arith.constant 0 : i32
    return %c0_i32, %arg1 : i32, i32
  }
  func.func @transform_3(%arg0: i32, %arg1: i32) -> (i32, i32) {
    %c0_i32 = arith.constant 0 : i32
    %c0_i32_0 = arith.constant 0 : i32
    return %arg1, %c0_i32 : i32, i32
  }
  func.func @transform_4(%arg0: i32, %arg1: i32) -> (i32, i32) {
    %c0_i32 = arith.constant 0 : i32
    %c0_i32_0 = arith.constant 0 : i32
    %c0_i32_1 = arith.constant 0 : i32
    return %c0_i32, %c0_i32_0 : i32, i32
  }
  func.func @transform_5(%arg0: i32, %arg1: i32) -> (i32, i32) {
    %c0_i32 = arith.constant 0 : i32
    %c0_i32_0 = arith.constant 0 : i32
    return %arg0, %c0_i32 : i32, i32
  }
}

</mosaic_0001>

<bundles_post_ra>
// kernel: feed_forward.1
= control target key start
LH: loop header
LB: loop body
LE: loop exit
PB: predicated region body
PF: predicated region fallthrough
CT: control target
= control target key end

     0   :  { %10 = vsyncpa [#allocation4], 0  ;;  %s964_s0 = inlined_call_operand.vmem [shape: bf16[16,32], index: 0, kind: input, shape index: {}]   ;;  %s965_s1 = inlined_call_operand.vmem [shape: bf16[32,128], index: 1, kind: input, shape index: {}]   ;;  %s966_s2 = inlined_call_operand.vmem [shape: f32[1,128], index: 2, kind: input, shape index: {}]   ;;  %s967_s3 = inlined_call_operand.vmem [shape: bf16[128,32], index: 3, kind: input, shape index: {}]   ;;  %s968_s4 = inlined_call_operand.vmem [shape: f32[1,32], index: 4, kind: input, shape index: {}]   ;;  %s969_s5 = inlined_call_operand.hbm [shape: f32[16,32], index: 5, kind: output, shape index: {}]  }
   0x1   :  { %12 = vsyncpa [#allocation4 + $0x1], 0  ;;  %s827_s18 = smov 0   ;;  %s829_s19 = smov 0  }
   0x2   :  { %s831_s20 = smov 0   ;;  %s833_s21 = smov 0  }
   0x3   :  { %s835_s22 = smov 0   ;;  %s837_s23 = smov 0  }
   0x4 LB: > { %s590_s24 = sadd.s32 4294967295, %s794_s23   ;;  %s591_s25 = sadd.s32 4294967294, %s794_s23   ;;  %s794_s23 = sphi %s837_s23, %s18_s23   ;;  %s790_s22 = sphi %s835_s22, %s976_s22   ;;  %s786_s21 = sphi %s833_s21, %s975_s21   ;;  %s782_s20 = sphi %s831_s20, %s974_s20   ;;  %s778_s19 = sphi %s829_s19, %s973_s19   ;;  %s774_s18 = sphi %s827_s18, %s972_s18  }
   0x5   : > { %s30_s26 = sadd.s32 1, %s790_s22  ;;  %s162_s27 = sadd.s32 1, %s782_s20 }
   0x6   : > { %p32_p0 = scmp.ge.s32.totalorder %s30_s26, 2  ;;  %p172_p1 = scmp.ne.s32.totalorder %s782_s20, %s778_s19 }
   0x7   : > { %p173_p2 = scmp.eq.s32.totalorder %s590_s24, 1  ;;  %p178_p3 = scmp.ne.s32.totalorder %s778_s19, %s774_s18 }
   0x8   : > { %s978_s26 = smov (%p32_p0, %s30_s26), 0  ;;  %p179_p5 = scmp.eq.s32.totalorder %s591_s25, 1 }
   0x9   : > { %p867_p4 = por %p173_p2, %p172_p1  ;;  %s159_s29 = ssub.s32 %s790_s22, %s978_s26 }
   0xa   : > { %p597_p6 = scmp.ge.s32.totalorder %s794_s23, 1  ;;  %p160_p7 = scmp.eq.s32.totalorder %s159_s29, 0 }
   0xb   : > { %p874_p8 = por %p179_p5, %p178_p3  ;;  %p229_p9 = scmp.lt.s32.totalorder %s794_s23, 3 }
   0xc   : > { %s880_s6 = scalar_select %p160_p7, %s782_s20, %s162_s27  }
   0xd   : > { %p230_p10 = pnand %p597_p6, %p229_p9 }
   0xe   : > { %p268_p11 = scmp.lt.s32.totalorder (!%p230_p10), %s786_s21, 1  ;;  %s265_s25 = sand.u32 (!%p230_p10), 1, %s778_s19  }
   0xf   : > { %233 = sbr.rel (%p230_p10) target bundleno = 350 (0x15e), region = 40  ;;  %s598_s27 = sshll.u32 (!%p230_p10), %s265_s25, 3 }
  0x10   : > { %s643_s29 = sshll.u32 (!%p230_p10), %s786_s21, 3 }
  0x11   : > { %s476_s9 = scalar_lea.hbm (!%p230_p10), %s969_s5, %s643_s29 }
  0x12   : > { %s480_s14 = sshll.u32 (!%p230_p10), %s476_s9, 4  ;;  %s481_s14 = int_to_ptr.hbm [resolvable:$true] %s480_s14 }
  0x14   : > { %v647_v0 = vld [vmem:[%s965_s1 + $0x8] sm:$0xff]  ;;  %vm290_vm0 = vcmask 261120   ;;  %v796_v1 = vmov 0.0   ;;  %v646_v2 = vld [vmem:[%s965_s1] sm:$0xff]  ;;  %s269_s11 = scalar_select %p268_p11, %s786_s21, 1  ;;  %v655_v4 = vld [vmem:[%s967_s3 + $0x38] sm:$0xff] }
  0x15   : > { %291 = vst.msk [vmem:[#allocation2] sm:$0xff] %vm290_vm0, %v796_v1  ;;  %323 = vmatpush.bf16.msra.mxu0 %v647_v0  ;;  %440 = vmatpush.bf16.msra.mxu1 %v655_v4  ;;  %v654_v5 = vld [vmem:[%s967_s3 + $0x30] sm:$0xff]  ;;  %v712_v6 = vld [vmem:[%s966_s2] ss:$0 sm:$0xff]  ;;  %v653_v7 = vld [vmem:[%s967_s3 + $0x28] sm:$0xff]  ;;  %s466_s21 = scalar_lea.sflag [#allocation4], %s265_s25 }
  0x16   : > { %s599_s12 = sshll.u32 %s269_s11, 2  ;;  %v652_v10 = vld [vmem:[%s967_s3 + $0x20] sm:$0xff]  ;;  %v651_v13 = vld [vmem:[%s967_s3 + $0x18] sm:$0xff]  ;;  %v650_v17 = vld [vmem:[%s967_s3 + $0x10] sm:$0xff] }
  0x17   : > { %s271_s15 = scalar_lea.vmem %s964_s0, %s599_s12  ;;  %v649_v22 = vld [vmem:[%s967_s3 + $0x8] sm:$0xff]  ;;  %v648_v26 = vld [vmem:[%s967_s3] sm:$0xff]  ;;  %s267_s12 = scalar_lea.vmem [#allocation3], %s598_s27 }
  0x18   : > { %v292_v3 = vld [vmem:[%s271_s15] sm:$0xf]  ;;  %s478_s13 = sshll.u32 %s267_s12, 4  ;;  %s730_s15 = sshra.s32 %s481_s14, 4  ;;  %s479_s13 = int_to_ptr.vmem [resolvable:$true] %s478_s13  ;;  %s731_s15 = int_to_ptr.hbm [resolvable:$true] %s730_s15 }
  0x19   : > { %324 = vmatpush.bf16.msra.mxu0 %v646_v2  ;;  %441 = vmatpush.bf16.msra.mxu1 %v654_v5  ;;  %v713_v59 = vld [vmem:[%s968_s4] ss:$0 sm:$0xff]  ;;  %s732_s16 = scalar_lea.hbm %s731_s15, 8  ;;  %s736_s27 = scalar_lea.hbm %s969_s5, 16 }
  0x1a   : > { %p733_p12 = scmp.ne.s32.totalorder %s731_s15, %s732_s16  ;;  %p737_p1 = scmp.lt.s32.totalorder %s731_s15, %s969_s5 }
  0x1b   : > { %p738_p2 = scmp.lt.s32.totalorder %s736_s27, %s732_s16 }
  0x1c   : > { %608 = vmatmul.msk.bf16.vlgmr.msra.gmra.mxu0 %vm290_vm0, %v292_v3  ;;  %v374_v56 = vld [vmem:[#allocation2] sm:$0xff]  ;;  %p734_p13 = pnand %p733_p12, %p867_p4 }
  0x1d   : > { %442 = vmatpush.bf16.msra.mxu1 %v653_v7  ;;  %p739_p3 = por %p738_p2, %p737_p1 }
  0x1e   : > { %p735_p0 = pneg %p734_p13 }
  0x20   : > { %p740_p5 = pnand %p739_p3, %p735_p0 }
  0x21   : > { %443 = vmatpush.bf16.msra.mxu1 %v652_v10 }
  0x25   : > { %444 = vmatpush.bf16.msra.mxu1 %v651_v13 }
  0x29   : > { %445 = vmatpush.bf16.msra.mxu1 %v650_v17 }
  0x2d   : > { %446 = vmatpush.bf16.msra.mxu1 %v649_v22 }
  0x31   : > { %447 = vmatpush.bf16.msra.mxu1 %v648_v26 }
  0x99   : > { %v326_v8 = vpop.f32.mrf.mxu0 }
  0x9a   : > { %v327_v9 = vadd.f32 %v712_v6, %v326_v8 }
  0x9c   : > { %v331_v11 = vmul.f32 0.70710677, %v327_v9  ;;  %v330_v52 = vmul.f32 0.5, %v327_v9 }
  0x9e   : > { %v332_v12 = vmul.f32 %v331_v11, %v331_v11 }
  0xa0   : > { %v333_v14 = vmin.f32 %v332_v12, 16.0 }
  0xa1   : > { %v328_v15 = vpop.f32.mrf.mxu0 }
  0xa2   : > { %v334_v16 = vmul.f32 2.1237322e-06, %v333_v14  ;;  %v345_v18 = vmul.f32 3.8918573e-05, %v333_v14 }
  0xa4   : > { %v335_v19 = vadd.f32 0.00028619796, %v334_v16  ;;  %v346_v20 = vadd.f32 0.001143296, %v345_v18 }
  0xa6   : > { %v336_v21 = vmul.f32 %v335_v19, %v333_v14  ;;  %v347_v23 = vmul.f32 %v346_v20, %v333_v14 }
  0xa8   : > { %v348_v24 = vadd.f32 0.014752088, %v347_v23  ;;  %v337_v25 = vadd.f32 0.0036580483, %v336_v21 }
  0xaa   : > { %v349_v27 = vmul.f32 %v348_v24, %v333_v14  ;;  %v338_v29 = vmul.f32 %v337_v25, %v333_v14 }
  0xac   : > { %v350_v28 = vadd.f32 0.112945676, %v349_v27  ;;  %v339_v32 = vadd.f32 0.05243302, %v338_v29 }
  0xae   : > { %v351_v30 = vmul.f32 %v350_v28, %v333_v14  ;;  %v340_v35 = vmul.f32 %v339_v32, %v333_v14 }
  0xb0   : > { %v352_v31 = vadd.f32 0.4994258, %v351_v30  ;;  %v341_v36 = vadd.f32 0.18741608, %v340_v35 }
  0xb2   : > { %v353_v33 = vmul.f32 %v352_v31, %v333_v14  ;;  %v342_v38 = vmul.f32 %v341_v36, %v333_v14 }
  0xb4   : > { %v354_v34 = vadd.f32 1.0, %v353_v33  ;;  %v343_v42 = vadd.f32 1.1283791, %v342_v38 }
  0xb6   : > { %714 = vrcp.f32 %v354_v34  ;;  %v366_v41 = vand.u32 2147483648, %v354_v34  ;;  %v364_v44 = vand.u32 2147483647, %v354_v34  ;;  %vm360_vm2 = vweird.f32 %v354_v34 }
  0xb7   : > { %v344_v47 = vmul.f32 %v343_v42, %v331_v11 }
  0xb8   : > { %v367_v46 = vor.u32 1.1754944e-38, %v366_v41  ;;  %vm365_vm4 = vcmp.eq.f32.partialorder %v364_v44, 8.507059e+37 }
  0xbc   : > { %v715_v37 = vpop.eup %714 }
  0xbd   : > { %v356_v39 = vmul.f32 %v715_v37, %v354_v34  ;;  %vm361_vm1 = vweird.f32 %v715_v37 }
  0xbe   : > { %vm362_vm3 = vmor %vm360_vm2, %vm361_vm1 }
  0xbf   : > { %v357_v40 = vsub.f32 1.0, %v356_v39 }
  0xc1   : > { %v358_v43 = vmul.f32 %v715_v37, %v357_v40 }
  0xc3   : > { %v359_v45 = vadd.f32 %v715_v37, %v358_v43 }
  0xc5   : > { %v363_v48 = vsel %vm362_vm3, %v715_v37, %v359_v45 }
  0xc6   : > { %v368_v49 = vsel %vm365_vm4, %v367_v46, %v363_v48 }
  0xc7   : > { %v369_v50 = vmul.f32 %v368_v49, %v344_v47 }
  0xc9   : > { %v609_v51 = vclamps-f32 %v369_v50, 1.0 }
  0xcb   : > { %v372_v53 = vadd.f32 1.0, %v609_v51 }
  0xcd   : > { %v373_v54 = vmul.f32 %v372_v53, %v330_v52 }
  0xcf   : > { %v375_v55 = vpack.c.bf16 %v373_v54, %v373_v54 }
  0xd1   : > { %448 = vmatmul.bf16.vlgmr.msra.gmra.mxu1 %v375_v55 }
 0x14e   : > { %v449_v57 = vpop.f32.mrf.mxu1 }
 0x14f   : > { %v453_v58 = vadd.f32 %v449_v57, %v374_v56 }
 0x151   : > { %454 = vst.msk [vmem:[#allocation2] sm:$0xff] %vm290_vm0, %v453_v58 }
 0x156   : > { %v451_v60 = vpop.f32.mrf.mxu1 }
 0x158   : > { %v458_v61 = vld [vmem:[#allocation2] sm:$0xff] }
 0x159   : > { %v463_v62 = vadd.f32 %v713_v59, %v458_v61 }
 0x15b   : > { %464 = vst.msk [vmem:[%s267_s12] sm:$0xff] %vm290_vm0, %v463_v62 }
 0x15c   : > { %743 = shalt.err (!%p740_p5)
}
 0x15d   : > { %656 = dma.vmem_to_hbm [thread:$0]  (%p867_p4), %s479_s13, 128, %s481_s14, %s466_s21  }
 0x15e PF: > { %p662_p6 = scmp.ge.s32.totalorder %s794_s23, 2  ;;  %s492_s25 = sand.u32 1, %s774_s18  }
 0x15f   : > { %s493_s8 = scalar_lea.sflag [#allocation4], %s492_s25 }
 0x160   : > { %p659_p7 = pnand %p662_p6, %p874_p8 }
 0x162   : > { %p660_p9 = pneg %p659_p7 }
 0x164   : > { %769 = dma.done.wait (%p660_p9), %s493_s8, 128  }
 0x165   : > { %771 = vsyncadd (%p660_p9), %s493_s8, 4294967168  ;;  %s18_s23 = sadd.s32 1, %s794_s23   ;;  %s972_s18 = smov %s778_s19 }
 0x166   : > { %p15_p10 = scmp.ge.s32.totalorder %s18_s23, 4   ;;  %s973_s19 = smov %s782_s20 }
 0x167   : > { %s974_s20 = smov %s880_s6  ;;  %s975_s21 = smov %s790_s22 }
 0x168   : > { %s976_s22 = smov %s978_s26  ;;  %17 = sbr.rel (!%p15_p10) target bundleno = 4 (0x4), region = 92 }
 0x16d   :  { %499 = vsyncpa [#allocation4], 1 }
 0x16e   :  { %501 = vsyncpa [#allocation4 + $0x1], 1 }

</bundles_post_ra>
